<compile_context>
chip_gen: v7x
topology: tpu7x:2x2x1
jax: 0.10.0
libtpu: 0.0.40
codegen_flags: <defaults>
</compile_context>

<pallas_src>
import math
import functools

import jax
import jax.numpy as jnp
from jax.experimental import pallas as pl
from jax.experimental.pallas import tpu as pltpu


LANE = 128            # last block dim padded to this (lane width)
SUBLANE = 8           # second-to-last block dims multiple of this
_VMEM_BUDGET = 8 * 1024 * 1024   # per-step double-buffered block budget
_ROW_TILE_CAP = 512              # max rows of adj/out per grid step


def _round_up(x, m):
    return (x + m - 1) // m * m


def _choose_row_tile(n_p, cap=_ROW_TILE_CAP):
    """Largest multiple of 8 that divides n_p, capped at `cap`."""
    tm = min(n_p, cap)
    tm -= tm % SUBLANE
    tm = max(tm, SUBLANE)
    while n_p % tm:
        tm -= SUBLANE
    return tm


def _choose_batch_tile(B, per_batch_bytes, budget=_VMEM_BUDGET):
    """Largest divisor of B whose double-buffered footprint fits the budget."""
    best = 1
    for bt in range(1, B + 1):
        if B % bt == 0 and 2 * bt * per_batch_bytes <= budget:
            best = bt
    return best


def _gcn_adj_kernel(inp_ref, adj_ref, w_ref, b_ref, out_ref, h_ref, *,
                    apply_relu, use_bf16):
    # inp_ref: (Bt, N_p, F_in_p)   adj_ref: (Bt, TM, N_p)
    # w_ref:   (F_in_p, F_out_p)   b_ref:   (1, F_out_p)
    # out_ref: (Bt, TM, F_out_p)   h_ref:   (Bt, N_p, F_out_p) f32 scratch
    r = pl.program_id(1)

    # h = x @ W + b, computed once per batch tile (row tile 0) into VMEM
    # scratch; the inp block index depends only on the batch axis, so it stays
    # resident and is not re-DMA'd across row tiles.
    @pl.when(r == 0)
    def _():
        bt, n_p, f_in = inp_ref.shape
        x = inp_ref[...].reshape(bt * n_p, f_in)     # leading-dim merge: free
        w = w_ref[...]
        if use_bf16:
            x = x.astype(jnp.bfloat16)
            w = w.astype(jnp.bfloat16)
        h = jnp.dot(x, w, preferred_element_type=jnp.float32) + b_ref[...]
        h_ref[...] = h.reshape(bt, n_p, -1)

    a = adj_ref[...]
    h = h_ref[...]
    if use_bf16:
        a = a.astype(jnp.bfloat16)
        h = h.astype(jnp.bfloat16)
    # Batched matmul on the MXU (jnp.dot is not batched -> einsum).
    o = jnp.einsum("bij,bjf->bif", a, h, preferred_element_type=jnp.float32)
    if apply_relu:
        o = jnp.maximum(o, 0.0)
    out_ref[...] = o.astype(out_ref.dtype)


def _gcn_noadj_kernel(inp_ref, w_ref, b_ref, out_ref, *, apply_relu, use_bf16):
    # inp_ref: (Bt, TM, F_in_p)  ->  out_ref: (Bt, TM, F_out_p)
    bt, tm, f_in = inp_ref.shape
    x = inp_ref[...].reshape(bt * tm, f_in)
    w = w_ref[...]
    if use_bf16:
        x = x.astype(jnp.bfloat16)
        w = w.astype(jnp.bfloat16)
    h = jnp.dot(x, w, preferred_element_type=jnp.float32) + b_ref[...]
    if apply_relu:
        h = jnp.maximum(h, 0.0)
    out_ref[...] = h.reshape(bt, tm, -1).astype(out_ref.dtype)


@functools.partial(jax.jit, static_argnames=("is_relu", "use_bf16_matmul"))
def gcn_forward(inp, adj, W, b, is_relu=True, use_bf16_matmul=False):
    B, N, F_in = inp.shape
    F_out = W.shape[1]

    # Zero-pad to TPU-friendly shapes (lane dims -> 128, sublane dims -> 8).
    # Exact: padded adj columns are zero, so the bias that leaks into padded
    # rows of h never reaches a real output row; padded rows/cols are sliced
    # off at the end.
    F_in_p = _round_up(F_in, LANE)
    F_out_p = _round_up(F_out, LANE)
    N_p = _round_up(N, SUBLANE)

    inp_p = jnp.pad(inp, ((0, 0), (0, N_p - N), (0, F_in_p - F_in)))
    W_p = jnp.pad(W, ((0, F_in_p - F_in), (0, F_out_p - F_out)))
    b_p = jnp.pad(b.reshape(1, F_out), ((0, 0), (0, F_out_p - F_out)))

    itemsize = 4
    TM = _choose_row_tile(N_p)

    if adj is not None:
        adj_p = jnp.pad(adj, ((0, 0), (0, N_p - N), (0, N_p - N)))
        per_batch = (N_p * F_in_p + TM * N_p + TM * F_out_p
                     + N_p * F_out_p) * itemsize
        Bt = _choose_batch_tile(B, per_batch)
        grid = (B // Bt, N_p // TM)
        kernel = functools.partial(_gcn_adj_kernel,
                                   apply_relu=bool(is_relu),
                                   use_bf16=bool(use_bf16_matmul))
        out_p = pl.pallas_call(
            kernel,
            out_shape=jax.ShapeDtypeStruct((B, N_p, F_out_p), inp.dtype),
            grid_spec=pltpu.PrefetchScalarGridSpec(
                num_scalar_prefetch=0,
                grid=grid,
                in_specs=[
                    # inp block index depends only on batch -> stays resident
                    # across the row-tile axis (h computed once per batch).
                    pl.BlockSpec((Bt, N_p, F_in_p), lambda bi, ri: (bi, 0, 0)),
                    pl.BlockSpec((Bt, TM, N_p), lambda bi, ri: (bi, ri, 0)),
                    pl.BlockSpec((F_in_p, F_out_p), lambda bi, ri: (0, 0)),
                    pl.BlockSpec((1, F_out_p), lambda bi, ri: (0, 0)),
                ],
                out_specs=pl.BlockSpec((Bt, TM, F_out_p),
                                       lambda bi, ri: (bi, ri, 0)),
                scratch_shapes=[pltpu.VMEM((Bt, N_p, F_out_p), jnp.float32)],
            ),
            compiler_params=pltpu.CompilerParams(
                # Row axis must be "arbitrary": the h scratch written at
                # ri == 0 is reused by later row tiles of the same batch.
                dimension_semantics=("parallel", "arbitrary"),
                vmem_limit_bytes=32 * 1024 * 1024,
            ),
        )(inp_p, adj_p, W_p, b_p)
    else:
        per_batch = (TM * F_in_p + TM * F_out_p) * itemsize
        Bt = _choose_batch_tile(B, per_batch)
        grid = (B // Bt, N_p // TM)
        kernel = functools.partial(_gcn_noadj_kernel,
                                   apply_relu=bool(is_relu),
                                   use_bf16=bool(use_bf16_matmul))
        out_p = pl.pallas_call(
            kernel,
            out_shape=jax.ShapeDtypeStruct((B, N_p, F_out_p), inp.dtype),
            grid_spec=pltpu.PrefetchScalarGridSpec(
                num_scalar_prefetch=0,
                grid=grid,
                in_specs=[
                    pl.BlockSpec((Bt, TM, F_in_p), lambda bi, ri: (bi, ri, 0)),
                    pl.BlockSpec((F_in_p, F_out_p), lambda bi, ri: (0, 0)),
                    pl.BlockSpec((1, F_out_p), lambda bi, ri: (0, 0)),
                ],
                out_specs=pl.BlockSpec((Bt, TM, F_out_p),
                                       lambda bi, ri: (bi, ri, 0)),
            ),
            compiler_params=pltpu.CompilerParams(
                dimension_semantics=("parallel", "parallel"),
                vmem_limit_bytes=32 * 1024 * 1024,
            ),
        )(inp_p, W_p, b_p)

    return out_p[:, :N, :F_out]


if __name__ == "__main__":
    # Small shapes consistent with the module: out_size = in_size // 2.
    B, N = 2, 8
    in_size, out_size = 32, 16

    key = jax.random.PRNGKey(0)
    k_inp, k_adj, k_w, k_b = jax.random.split(key, 4)

    # Deterministic parameter init mirroring GCN.init(): U(-stdv, stdv)
    stdv = 1.0 / math.sqrt(out_size)
    W = jax.random.uniform(k_w, (in_size, out_size), jnp.float32,
                           minval=-stdv, maxval=stdv)
    b = jax.random.uniform(k_b, (out_size,), jnp.float32,
                           minval=-stdv, maxval=stdv)

    inp = jax.random.normal(k_inp, (B, N, in_size), jnp.float32)
    adj = jax.random.uniform(k_adj, (B, N, N), jnp.float32)

    # Default path: adj + relu.
    out = jax.block_until_ready(gcn_forward(inp, adj, W, b))
    h_ref = jnp.matmul(inp, W) + b
    ref = jnp.maximum(jnp.matmul(adj, h_ref), 0.0)
    assert out.shape == (B, N, out_size)
    assert jnp.allclose(out, ref, atol=1e-5, rtol=1e-5), "mismatch (adj+relu)"

    # is_relu=False path.
    out_nr = jax.block_until_ready(gcn_forward(inp, adj, W, b, is_relu=False))
    assert jnp.allclose(out_nr, jnp.matmul(adj, h_ref), atol=1e-5, rtol=1e-5), \
        "mismatch (no relu)"

    # adj=None path.
    out_na = jax.block_until_ready(gcn_forward(inp, None, W, b))
    assert jnp.allclose(out_na, jnp.maximum(h_ref, 0.0), atol=1e-5, rtol=1e-5), \
        "mismatch (no adj)"

    print("KERNEL_OK")
</pallas_src>

<mosaic_0001>
module attributes {stable_mosaic.version = 11 : i64} {
  func.func @_gcn_adj_kernel(%arg0: i32, %arg1: i32, %arg2: memref<2x8x128xf32, #tpu.memory_space<vmem>>, %arg3: memref<2x8x8xf32, #tpu.memory_space<vmem>>, %arg4: memref<128x128xf32, #tpu.memory_space<vmem>>, %arg5: memref<1x128xf32, #tpu.memory_space<vmem>>, %arg6: memref<2x8x128xf32, #tpu.memory_space<vmem>>, %arg7: memref<2x8x128xf32, #tpu.memory_space<vmem>>) attributes {dimension_semantics = [#tpu.dimension_semantics<parallel>, #tpu.dimension_semantics<arbitrary>], iteration_bounds = array<i64: 1, 1>, scalar_prefetch = 0 : i64, scratch_operands = 1 : i64, tpu.core_type = #tpu.core_type<tc>, window_params = [{transform_indices = @transform_0, window_bounds = array<i64: 2, 8, 128>}, {transform_indices = @transform_1, window_bounds = array<i64: 2, 8, 8>}, {pipeline_mode = #tpu.pipeline_mode<synchronous>, transform_indices = @transform_2, window_bounds = array<i64: 128, 128>}, {pipeline_mode = #tpu.pipeline_mode<synchronous>, transform_indices = @transform_3, window_bounds = array<i64: 1, 128>}, {transform_indices = @transform_4, window_bounds = array<i64: 2, 8, 128>}]} {
    %c0_i32 = arith.constant 0 : i32
    %0 = arith.cmpi eq, %arg1, %c0_i32 : i32
    %1 = arith.extui %0 : i1 to i32
    %c0_i32_0 = arith.constant 0 : i32
    %2 = arith.cmpi ne, %1, %c0_i32_0 : i32
    scf.if %2 {
      %c0_10 = arith.constant 0 : index
      %c0_11 = arith.constant 0 : index
      %c0_12 = arith.constant 0 : index
      %9 = vector.load %arg2[%c0_10, %c0_11, %c0_12] : memref<2x8x128xf32, #tpu.memory_space<vmem>>, vector<2x8x128xf32>
      %10 = vector.shape_cast %9 : vector<2x8x128xf32> to vector<16x128xf32>
      %c0_13 = arith.constant 0 : index
      %c0_14 = arith.constant 0 : index
      %11 = vector.load %arg4[%c0_13, %c0_14] : memref<128x128xf32, #tpu.memory_space<vmem>>, vector<128x128xf32>
      %cst_15 = arith.constant dense<0.000000e+00> : vector<16x128xf32>
      %12 = tpu.matmul %10, %11, %cst_15 {dimension_numbers = #tpu.dot_dimension_numbers<[1], [0], [0], [1], [0, 0, 1, 1], [], []>} : vector<16x128xf32>, vector<128x128xf32>, vector<16x128xf32> -> vector<16x128xf32>
      %c0_16 = arith.constant 0 : index
      %c0_17 = arith.constant 0 : index
      %13 = vector.load %arg5[%c0_16, %c0_17] : memref<1x128xf32, #tpu.memory_space<vmem>>, vector<1x128xf32>
      %14 = vector.broadcast %13 : vector<1x128xf32> to vector<16x128xf32>
      %15 = arith.addf %12, %14 : vector<16x128xf32>
      %16 = vector.shape_cast %15 : vector<16x128xf32> to vector<2x8x128xf32>
      %c0_18 = arith.constant 0 : index
      %c0_19 = arith.constant 0 : index
      %c0_20 = arith.constant 0 : index
      %17 = vector.load %arg7[%c0_18, %c0_19, %c0_20] : memref<2x8x128xf32, #tpu.memory_space<vmem>>, vector<2x8x128xf32>
      tpu.vector_store %arg7[%c0_18, %c0_19, %c0_20], %16 {strides = array<i32>} : memref<2x8x128xf32, #tpu.memory_space<vmem>>, vector<2x8x128xf32>,
    } else {
    }
    %c0 = arith.constant 0 : index
    %c0_1 = arith.constant 0 : index
    %c0_2 = arith.constant 0 : index
    %3 = vector.load %arg3[%c0, %c0_1, %c0_2] : memref<2x8x8xf32, #tpu.memory_space<vmem>>, vector<2x8x8xf32>
    %c0_3 = arith.constant 0 : index
    %c0_4 = arith.constant 0 : index
    %c0_5 = arith.constant 0 : index
    %4 = vector.load %arg7[%c0_3, %c0_4, %c0_5] : memref<2x8x128xf32, #tpu.memory_space<vmem>>, vector<2x8x128xf32>
    "tpu.trace_start"() <{level = 10 : i32, message = "bij,bjf->bif"}> : () -> ()
    %cst = arith.constant dense<0.000000e+00> : vector<2x8x128xf32>
    %5 = tpu.matmul %3, %4, %cst {dimension_numbers = #tpu.dot_dimension_numbers<[2], [1], [1], [2], [0, 0, 0, 1, 1, 2], [0], [0]>} : vector<2x8x8xf32>, vector<2x8x128xf32>, vector<2x8x128xf32> -> vector<2x8x128xf32>
    "tpu.trace_stop"() : () -> ()
    %cst_6 = arith.constant 0.000000e+00 : f32
    %6 = vector.broadcast %cst_6 : f32 to vector<2x8x128xf32>
    %7 = arith.maximumf %5, %6 : vector<2x8x128xf32>
    %c0_7 = arith.constant 0 : index
    %c0_8 = arith.constant 0 : index
    %c0_9 = arith.constant 0 : index
    %8 = vector.load %arg6[%c0_7, %c0_8, %c0_9] : memref<2x8x128xf32, #tpu.memory_space<vmem>>, vector<2x8x128xf32>
    tpu.vector_store %arg6[%c0_7, %c0_8, %c0_9], %7 {strides = array<i32>} : memref<2x8x128xf32, #tpu.memory_space<vmem>>, vector<2x8x128xf32>,
    return
  }
  func.func @transform_0(%arg0: i32, %arg1: i32) -> (i32, i32, i32) {
    %c0_i32 = arith.constant 0 : i32
    %c0_i32_0 = arith.constant 0 : i32
    %c0_i32_1 = arith.constant 0 : i32
    return %arg0, %c0_i32, %c0_i32_0 : i32, i32, i32
  }
  func.func @transform_1(%arg0: i32, %arg1: i32) -> (i32, i32, i32) {
    %c0_i32 = arith.constant 0 : i32
    %c0_i32_0 = arith.constant 0 : i32
    return %arg0, %arg1, %c0_i32 : i32, i32, i32
  }
  func.func @transform_2(%arg0: i32, %arg1: i32) -> (i32, i32) {
    %c0_i32 = arith.constant 0 : i32
    %c0_i32_0 = arith.constant 0 : i32
    %c0_i32_1 = arith.constant 0 : i32
    return %c0_i32, %c0_i32_0 : i32, i32
  }
  func.func @transform_3(%arg0: i32, %arg1: i32) -> (i32, i32) {
    %c0_i32 = arith.constant 0 : i32
    %c0_i32_0 = arith.constant 0 : i32
    %c0_i32_1 = arith.constant 0 : i32
    return %c0_i32, %c0_i32_0 : i32, i32
  }
  func.func @transform_4(%arg0: i32, %arg1: i32) -> (i32, i32, i32) {
    %c0_i32 = arith.constant 0 : i32
    %c0_i32_0 = arith.constant 0 : i32
    return %arg0, %arg1, %c0_i32 : i32, i32, i32
  }
}

</mosaic_0001>

<bundles_post_ra>
// kernel: gcn_forward.1
= control target key start
LH: loop header
LB: loop body
LE: loop exit
PB: predicated region body
PF: predicated region fallthrough
CT: control target
= control target key end

     0   :  { %s531_s0 = inlined_call_operand.vmem [shape: f32[2,8,128], index: 0, kind: input, shape index: {}]   ;;  %s532_s1 = inlined_call_operand.vmem [shape: f32[2,8,8], index: 1, kind: input, shape index: {}]   ;;  %s533_s2 = inlined_call_operand.vmem [shape: f32[128,128], index: 2, kind: input, shape index: {}]   ;;  %s534_s3 = inlined_call_operand.vmem [shape: f32[1,128], index: 3, kind: input, shape index: {}]   ;;  %s535_s4 = inlined_call_operand.hbm [shape: f32[2,8,128], index: 4, kind: output, shape index: {}]  }
   0x1   :  { %v24_v0 = vld [vmem:[%s533_s2] sm:$0xff]  ;;  %v25_v1 = vld [vmem:[%s533_s2 + $0x8] sm:$0xff]  ;;  %v26_v2 = vld [vmem:[%s533_s2 + $0x10] sm:$0xff] }
   0x2   :  { %v365_v3 = vpack.c.bf16 %v25_v1, %v24_v0  ;;  %v27_v4 = vld [vmem:[%s533_s2 + $0x18] sm:$0xff]  ;;  %v28_v6 = vld [vmem:[%s533_s2 + $0x20] sm:$0xff]  ;;  %v29_v7 = vld [vmem:[%s533_s2 + $0x28] sm:$0xff] }
   0x3   :  { %v369_v5 = vpack.c.bf16 %v27_v4, %v26_v2  ;;  %v373_v8 = vpack.c.bf16 %v29_v7, %v28_v6  ;;  %v22_v9 = vld [vmem:[%s531_s0] sm:$0xff]  ;;  %v30_v10 = vld [vmem:[%s533_s2 + $0x30] sm:$0xff]  ;;  %v31_v11 = vld [vmem:[%s533_s2 + $0x38] sm:$0xff] }
   0x4   :  { %366 = vmatprep.subr.bf16.mxu0 %v365_v3  ;;  %352 = vmatprep.mubr.f32.mxu0 %v22_v9 }
   0x5   :  { %368 = vmatpush3.bf16.msra.mxu0 %v365_v3 }
   0x6   :  { %370 = vmatprep.subr.bf16.mxu0 %v369_v5 }
   0x7   :  { %9 = vsyncpa [#allocation4], 0  ;;  %v377_v12 = vpack.c.bf16 %v31_v11, %v30_v10  ;;  %v32_v13 = vld [vmem:[%s533_s2 + $0x40] sm:$0xff]  ;;  %v33_v14 = vld [vmem:[%s533_s2 + $0x48] sm:$0xff]  ;;  %v426_v26 = vmov 0.0   ;;  %vm427_vm0 = vmmov 0  }
   0x8   :  { %v381_v15 = vpack.c.bf16 %v33_v14, %v32_v13  ;;  %v34_v16 = vld [vmem:[%s533_s2 + $0x50] sm:$0xff]  ;;  %v35_v17 = vld [vmem:[%s533_s2 + $0x58] sm:$0xff]  ;;  %v36_v19 = vld [vmem:[%s533_s2 + $0x60] sm:$0xff]  ;;  %355 = vmatprep.subr.mxu1 %v426_v26  ;;  %357 = vmatprep.mubr.msk.f32.mxu1 %vm427_vm0, %v426_v26  ;;  %vm128_vm1 = vcmask 64512  }
   0x9   :  { %372 = vmatpush3.bf16.msra.mxu0 %v369_v5  ;;  %v385_v18 = vpack.c.bf16 %v35_v17, %v34_v16  ;;  %v37_v20 = vld [vmem:[%s533_s2 + $0x68] sm:$0xff]  ;;  %v38_v22 = vld [vmem:[%s533_s2 + $0x70] sm:$0xff]  ;;  %v39_v23 = vld [vmem:[%s533_s2 + $0x78] sm:$0xff] }
   0xa   :  { %374 = vmatprep.subr.bf16.mxu0 %v373_v8  ;;  %v389_v21 = vpack.c.bf16 %v37_v20, %v36_v19  ;;  %v393_v24 = vpack.c.bf16 %v39_v23, %v38_v22  ;;  %v23_v25 = vld [vmem:[%s531_s0 + $0x8] sm:$0xff]  ;;  %v295_v27 = vld [vmem:[%s534_s3] ss:$0 sm:$0xff]  ;;  %s428_s3 = smov [#allocation3]  }
   0xb   :  { %v124_v31 = vld [vmem:[%s532_s1] sm:$0xff]  ;;  %v125_v33 = vld [vmem:[%s532_s1 + $0x8] sm:$0xff]  ;;  %s284_s29 = sshll.u32 %s428_s3, 4  ;;  %s285_s29 = int_to_ptr.vmem [resolvable:$true] %s284_s29 }
   0xc   :  { %s402_s30 = scalar_lea.vmem %s285_s29, 256  ;;  %p407_p1 = scmp.lt.s32.totalorder %s285_s29, %s285_s29 }
   0xd   :  { %376 = vmatpush3.bf16.msra.mxu0 %v373_v8  ;;  %p403_p0 = scmp.ne.s32.totalorder %s285_s29, %s402_s30  ;;  %p408_p2 = scmp.lt.s32.totalorder %s402_s30, %s402_s30 }
   0xe   :  { %378 = vmatprep.subr.bf16.mxu0 %v377_v12 }
   0xf   :  { %p409_p3 = por %p408_p2, %p407_p1 }
  0x11   :  { %380 = vmatpush3.bf16.msra.mxu0 %v377_v12  ;;  %p410_p4 = pnand %p409_p3, %p403_p0 }
  0x12   :  { %382 = vmatprep.subr.bf16.mxu0 %v381_v15 }
  0x15   :  { %384 = vmatpush3.bf16.msra.mxu0 %v381_v15 }
  0x16   :  { %386 = vmatprep.subr.bf16.mxu0 %v385_v18 }
  0x19   :  { %388 = vmatpush3.bf16.msra.mxu0 %v385_v18 }
  0x1a   :  { %390 = vmatprep.subr.bf16.mxu0 %v389_v21 }
  0x1d   :  { %392 = vmatpush3.bf16.msra.mxu0 %v389_v21 }
  0x1e   :  { %394 = vmatprep.subr.bf16.mxu0 %v393_v24 }
  0x21   :  { %396 = vmatpush3.bf16.msra.mxu0 %v393_v24 }
  0x24   :  { %353 = vmatmul.mubr.f32.vlgmr.msra.gmra.mrb[0].mxu0 %v23_v25 }
  0xf7   :  { %v354_v28 = vpop.f32.mrb[0].mxu0 }
  0xf8   :  { %v113_v29 = vpop.f32.mrb[1].mxu0  ;;  %v119_v32 = vadd.f32 %v354_v28, %v295_v27 }
  0xf9   :  { %v114_v30 = vadd.f32 %v295_v27, %v113_v29 }
  0xfb   :  { %356 = vmatpush3.msra.mxu1 %v114_v30 }
  0xfc   :  { %358 = vmatmul.mubr.msk.f32.vlgmr.msra.gmra.mrb[0].mxu1 %vm128_vm1, %v124_v31  ;;  %360 = vmatprep.subr.mxu1 %v426_v26 }
  0xfd   :  { %361 = vmatpush3.msra.mxu1 %v119_v32  ;;  %362 = vmatprep.mubr.msk.f32.mxu1 %vm427_vm0, %v426_v26 }
 0x100   :  { %363 = vmatmul.mubr.msk.f32.vlgmr.msra.gmra.mrb[2].mxu1 %vm128_vm1, %v125_v33 }
 0x1cf   :  { %v198_v34 = vpop.f32.mrb[0].mxu1 }
 0x1d0   :  { %v275_v35 = vmax.f32 %v198_v34, 0.0  ;;  %v359_v36 = vpop.f32.mrb[1].mxu1 }
 0x1d2   :  { %277 = vst [vmem:[#allocation3] sm:$0xff] %v275_v35 }
 0x1d3   :  { %v271_v37 = vpop.f32.mrb[2].mxu1 }
 0x1d4   :  { %v276_v38 = vmax.f32 %v271_v37, 0.0  ;;  %v364_v39 = vpop.f32.mrb[3].mxu1 }
 0x1d6   :  { %278 = vst [vmem:[#allocation3 + $0x8] sm:$0xff] %v276_v38 }
 0x1d7   :  { %413 = shalt.err (!%p410_p4)
}
 0x1d8   :  { %s414_s6 = scalar_lea.hbm %s535_s4, 256 }
 0x1d9   :  { %p415_p5 = scmp.ne.s32.totalorder %s535_s4, %s414_s6  ;;  %p418_p6 = scmp.lt.u32.totalorder %s414_s6, %s535_s4 }
 0x1db   :  { %p420_p7 = pnand %p418_p6, %p415_p5 }
 0x1dd   :  { %423 = shalt.err (!%p420_p7)
}
 0x1de   :  { %s429_s11 = smov 128   ;;  %s430_s12 = smov 8  }
 0x1df   :  { %290 = dma.vmem_to_hbm [thread:$0]  %s285_s29, 256, %s535_s4, [#allocation4], %s429_s11, %s429_s11, %s430_s12  }
 0x1e0   :  { %424 = dma.done.wait [#allocation4], 256  }
 0x1e1   :  { %425 = vsyncadd [#allocation4], 4294967040 }
 0x1e2   :  { %294 = vsyncpa [#allocation4], 1 }

</bundles_post_ra>
